<compile_context>
chip_gen: v7x
topology: tpu7x:2x2x1
jax: 0.10.0
libtpu: 0.0.40
codegen_flags: <defaults>
</compile_context>

<pallas_src>
import functools

import jax
import jax.numpy as jnp
from jax.experimental import pallas as pl
from jax.experimental.pallas import tpu as pltpu

LANES = 128
SUBLANES = 8


def _label_smoothing_kernel(pred_ref, tgt_ref, out_ref, acc_ref, *,
                            confidence, smooth_val, n_valid, tile_r,
                            n_classes, tiles_per_core):
    # pred_ref: (C, tile_r, 128) logits in VMEM (math in f32)
    # tgt_ref:  (tile_r, 128) int32 class indices in VMEM
    # out_ref:  (8, 128) f32 per-core partial sums (written on the last step)
    # acc_ref:  (tile_r, 128) f32 VMEM scratch (per-position running sum)
    core = pl.program_id(0)
    i = pl.program_id(1)
    n_inner = pl.num_programs(1)

    @pl.when(i == 0)
    def _():
        acc_ref[...] = jnp.zeros_like(acc_ref)

    p = pred_ref[...].astype(jnp.float32)          # (C, tile_r, 128)
    tgt = tgt_ref[...]                             # (tile_r, 128)

    # Max over the tiny static class axis: unrolled VPU ops (classes live on
    # the leading axis -> separate full-density vregs, no XLU reductions).
    m = p[0]
    for c in range(1, n_classes):
        m = jnp.maximum(m, p[c])

    # shifted_c = p_c - m ; lse = log(sum_c exp(shifted_c))
    # loss_sample = lse - smooth*sum_c(shifted_c) - (conf - smooth)*shifted[tgt]
    s0 = p[0] - m
    sum_shift = s0
    sum_exp = jnp.exp(s0)
    sel = s0
    for c in range(1, n_classes):
        sc = p[c] - m
        sum_shift = sum_shift + sc
        sum_exp = sum_exp + jnp.exp(sc)
        sel = jnp.where(tgt == c, sc, sel)
    lse = jnp.log(sum_exp)

    per_sample = (lse
                  - jnp.float32(smooth_val) * sum_shift
                  - jnp.float32(confidence - smooth_val) * sel)

    tile_samples = tile_r * LANES
    global_tile = core * tiles_per_core + i
    needs_mask = (global_tile + 1) * tile_samples > n_valid

    # Masked accumulate only on steps that actually contain padded samples.
    @pl.when(needs_mask)
    def _():
        row = jax.lax.broadcasted_iota(jnp.int32, (tile_r, LANES), 0)
        lane = jax.lax.broadcasted_iota(jnp.int32, (tile_r, LANES), 1)
        gidx = (global_tile * tile_r + row) * LANES + lane
        acc_ref[...] += jnp.where(gidx < n_valid, per_sample, 0.0)

    @pl.when(jnp.logical_not(needs_mask))
    def _():
        acc_ref[...] += per_sample

    # Finalize: fold the (tile_r, 128) accumulator down to one (8, 128) block.
    @pl.when(i == n_inner - 1)
    def _():
        acc = acc_ref[...]
        part = acc[0:SUBLANES, :]
        for g in range(1, tile_r // SUBLANES):
            part = part + acc[g * SUBLANES:(g + 1) * SUBLANES, :]
        out_ref[...] = part


def label_smoothing_loss(pred, target, classes=3, smoothing=0.1,
                         tile_rows=2048):
    """pred: (N, C) float logits, target: (N,) int class indices."""
    n, c = pred.shape
    assert c == classes
    confidence = 1.0 - smoothing
    smooth_val = smoothing / (classes - 1)

    # Pad the batch to a multiple of 8*128 so it reshapes to (R, 128) with
    # R % 8 == 0 (<= 1023 extra samples; fuses into the relayout copy below).
    r_pad = SUBLANES * int(pl.cdiv(n, SUBLANES * LANES))
    n_pad = r_pad * LANES
    if n_pad != n:
        pred = jnp.pad(pred, ((0, n_pad - n), (0, 0)))
        target = jnp.pad(target, ((0, n_pad - n),))

    # Class-major, 2D (sublane x lane) dense batch layout.
    # TODO(synk): if the producer can emit pred already as (C, N) this copy
    # (one extra pred read+write) disappears entirely.
    pred_cml = jnp.transpose(pred).reshape(classes, r_pad, LANES)   # (C, R, 128)
    tgt_ml = target.astype(jnp.int32).reshape(r_pad, LANES)         # (R, 128)

    tile_r = int(min(int(tile_rows), r_pad))
    tile_r = max(SUBLANES, (tile_r // SUBLANES) * SUBLANES)
    num_tiles = int(pl.cdiv(r_pad, tile_r))
    num_cores = 2                      # 2 TCs on v7x; pure outer loop on v5e/v6e
    tiles_per_core = int(pl.cdiv(num_tiles, num_cores))

    def pred_map(core, i):
        t = jnp.minimum(core * tiles_per_core + i, num_tiles - 1)
        return (0, t, 0)

    def tgt_map(core, i):
        t = jnp.minimum(core * tiles_per_core + i, num_tiles - 1)
        return (t, 0)

    def out_map(core, i):
        return (core, 0, 0)

    kernel = functools.partial(
        _label_smoothing_kernel,
        confidence=confidence, smooth_val=smooth_val, n_valid=n,
        tile_r=tile_r, n_classes=classes, tiles_per_core=tiles_per_core)

    cost = pl.CostEstimate(
        flops=int(14 * n * classes),
        transcendentals=int((classes + 1) * n),
        bytes_accessed=int(n * (classes * pred.dtype.itemsize + 4)
                           + num_cores * SUBLANES * LANES * 4),
    )

    partials = pl.pallas_call(
        kernel,
        out_shape=jax.ShapeDtypeStruct((num_cores, SUBLANES, LANES),
                                       jnp.float32),
        grid_spec=pltpu.PrefetchScalarGridSpec(
            num_scalar_prefetch=0,
            grid=(num_cores, tiles_per_core),
            in_specs=[
                pl.BlockSpec((classes, tile_r, LANES), pred_map),
                pl.BlockSpec((tile_r, LANES), tgt_map),
            ],
            out_specs=pl.BlockSpec((None, SUBLANES, LANES), out_map),
            scratch_shapes=[pltpu.VMEM((tile_r, LANES), jnp.float32)],
        ),
        compiler_params=pltpu.CompilerParams(
            dimension_semantics=("parallel", "arbitrary"),
            vmem_limit_bytes=48 * 1024 * 1024,
        ),
        cost_estimate=cost,
    )(pred_cml, tgt_ml)

    return jnp.sum(partials) / jnp.float32(n)


def _reference(pred, target, classes, smoothing):
    logp = jax.nn.log_softmax(pred.astype(jnp.float32), axis=-1)
    n = pred.shape[0]
    true_dist = jnp.full((n, classes), smoothing / (classes - 1),
                         dtype=jnp.float32)
    true_dist = true_dist.at[jnp.arange(n), target].set(1.0 - smoothing)
    return jnp.mean(jnp.sum(-true_dist * logp, axis=-1))


if __name__ == "__main__":
    classes, smoothing = 3, 0.1
    key = jax.random.PRNGKey(0)
    k1, k2, k3, k4, k5, k6 = jax.random.split(key, 6)

    # Primary example: module forward takes (N, 3) logits and (N,) int targets.
    pred = jax.random.normal(k1, (8, classes), dtype=jnp.float32)
    target = jax.random.randint(k2, (8,), 0, classes, dtype=jnp.int32)
    loss = label_smoothing_loss(pred, target, classes=classes,
                                smoothing=smoothing)
    jax.block_until_ready(loss)
    ref = _reference(pred, target, classes, smoothing)
    assert jnp.allclose(loss, ref, atol=1e-5, rtol=1e-5)

    # Partial (sublane x lane) tile masking, single tile per core.
    pred2 = jax.random.normal(k3, (300, classes), dtype=jnp.float32)
    target2 = jax.random.randint(k4, (300,), 0, classes, dtype=jnp.int32)
    loss2 = label_smoothing_loss(pred2, target2, classes=classes,
                                 smoothing=smoothing)
    jax.block_until_ready(loss2)
    ref2 = _reference(pred2, target2, classes, smoothing)
    assert jnp.allclose(loss2, ref2, atol=1e-5, rtol=1e-5)

    # Multi-tile grid: inner-axis accumulation on both cores, one clamped
    # overshoot tile (fully masked) and one partially masked last tile.
    pred3 = jax.random.normal(k5, (5000, classes), dtype=jnp.float32)
    target3 = jax.random.randint(k6, (5000,), 0, classes, dtype=jnp.int32)
    loss3 = label_smoothing_loss(pred3, target3, classes=classes,
                                 smoothing=smoothing, tile_rows=8)
    jax.block_until_ready(loss3)
    ref3 = _reference(pred3, target3, classes, smoothing)
    assert jnp.allclose(loss3, ref3, atol=1e-5, rtol=1e-5)

    print("KERNEL_OK")
</pallas_src>

<mosaic_0001>
module attributes {stable_mosaic.version = 11 : i64} {
  func.func @_label_smoothing_kernel(%arg0: i32, %arg1: i32, %arg2: memref<3x8x128xf32, #tpu.memory_space<vmem>>, %arg3: memref<8x128xi32, #tpu.memory_space<vmem>>, %arg4: memref<1x8x128xf32, #tpu.memory_space<vmem>>, %arg5: memref<8x128xf32, #tpu.memory_space<vmem>>) attributes {dimension_semantics = [#tpu.dimension_semantics<parallel>, #tpu.dimension_semantics<arbitrary>], iteration_bounds = array<i64: 2, 1>, scalar_prefetch = 0 : i64, scratch_operands = 1 : i64, tpu.core_type = #tpu.core_type<tc>, window_params = [{transform_indices = @transform_0, window_bounds = array<i64: 3, 8, 128>}, {transform_indices = @transform_1, window_bounds = array<i64: 8, 128>}, {transform_indices = @transform_2, window_bounds = array<i64: 1, 8, 128>}]} {
    %c0_i32 = arith.constant 0 : i32
    %0 = arith.cmpi eq, %arg1, %c0_i32 : i32
    %1 = arith.extui %0 : i1 to i32
    %c0_i32_0 = arith.constant 0 : i32
    %2 = arith.cmpi ne, %1, %c0_i32_0 : i32
    scf.if %2 {
      %cst_12 = arith.constant 0.000000e+00 : f32
      %55 = vector.broadcast %cst_12 : f32 to vector<8x128xf32>
      %c0_13 = arith.constant 0 : index
      %c0_14 = arith.constant 0 : index
      %56 = vector.load %arg5[%c0_13, %c0_14] : memref<8x128xf32, #tpu.memory_space<vmem>>, vector<8x128xf32>
      tpu.vector_store %arg5[%c0_13, %c0_14], %55 {strides = array<i32>} : memref<8x128xf32, #tpu.memory_space<vmem>>, vector<8x128xf32>,
    } else {
    }
    %c0 = arith.constant 0 : index
    %c0_1 = arith.constant 0 : index
    %c0_2 = arith.constant 0 : index
    %3 = vector.load %arg2[%c0, %c0_1, %c0_2] : memref<3x8x128xf32, #tpu.memory_space<vmem>>, vector<3x8x128xf32>
    %c0_3 = arith.constant 0 : index
    %c0_4 = arith.constant 0 : index
    %4 = vector.load %arg3[%c0_3, %c0_4] : memref<8x128xi32, #tpu.memory_space<vmem>>, vector<8x128xi32>
    %5 = vector.extract_strided_slice %3 {offsets = [0, 0, 0], sizes = [1, 8, 128], strides = [1, 1, 1]} : vector<3x8x128xf32> to vector<1x8x128xf32>
    %6 = vector.shape_cast %5 : vector<1x8x128xf32> to vector<8x128xf32>
    %7 = vector.extract_strided_slice %3 {offsets = [1, 0, 0], sizes = [1, 8, 128], strides = [1, 1, 1]} : vector<3x8x128xf32> to vector<1x8x128xf32>
    %8 = vector.shape_cast %7 : vector<1x8x128xf32> to vector<8x128xf32>
    %9 = arith.maximumf %6, %8 : vector<8x128xf32>
    %10 = vector.extract_strided_slice %3 {offsets = [2, 0, 0], sizes = [1, 8, 128], strides = [1, 1, 1]} : vector<3x8x128xf32> to vector<1x8x128xf32>
    %11 = vector.shape_cast %10 : vector<1x8x128xf32> to vector<8x128xf32>
    %12 = arith.maximumf %9, %11 : vector<8x128xf32>
    %13 = vector.extract_strided_slice %3 {offsets = [0, 0, 0], sizes = [1, 8, 128], strides = [1, 1, 1]} : vector<3x8x128xf32> to vector<1x8x128xf32>
    %14 = vector.shape_cast %13 : vector<1x8x128xf32> to vector<8x128xf32>
    %15 = arith.subf %14, %12 : vector<8x128xf32>
    %16 = math.exp %15 : vector<8x128xf32>
    %17 = vector.extract_strided_slice %3 {offsets = [1, 0, 0], sizes = [1, 8, 128], strides = [1, 1, 1]} : vector<3x8x128xf32> to vector<1x8x128xf32>
    %18 = vector.shape_cast %17 : vector<1x8x128xf32> to vector<8x128xf32>
    %19 = arith.subf %18, %12 : vector<8x128xf32>
    %20 = arith.addf %15, %19 : vector<8x128xf32>
    %21 = math.exp %19 : vector<8x128xf32>
    %22 = arith.addf %16, %21 : vector<8x128xf32>
    %c1_i32 = arith.constant 1 : i32
    %23 = vector.broadcast %c1_i32 : i32 to vector<8x128xi32>
    %24 = arith.cmpi eq, %4, %23 : vector<8x128xi32>
    %25 = arith.select %24, %19, %15 : vector<8x128xi1>, vector<8x128xf32>
    %26 = vector.extract_strided_slice %3 {offsets = [2, 0, 0], sizes = [1, 8, 128], strides = [1, 1, 1]} : vector<3x8x128xf32> to vector<1x8x128xf32>
    %27 = vector.shape_cast %26 : vector<1x8x128xf32> to vector<8x128xf32>
    %28 = arith.subf %27, %12 : vector<8x128xf32>
    %29 = arith.addf %20, %28 : vector<8x128xf32>
    %30 = math.exp %28 : vector<8x128xf32>
    %31 = arith.addf %22, %30 : vector<8x128xf32>
    %c2_i32 = arith.constant 2 : i32
    %32 = vector.broadcast %c2_i32 : i32 to vector<8x128xi32>
    %33 = arith.cmpi eq, %4, %32 : vector<8x128xi32>
    %34 = arith.select %33, %28, %25 : vector<8x128xi1>, vector<8x128xf32>
    %35 = math.log %31 : vector<8x128xf32>
    %cst = arith.constant 5.000000e-02 : f32
    %36 = vector.broadcast %cst : f32 to vector<8x128xf32>
    %37 = arith.mulf %36, %29 : vector<8x128xf32>
    %38 = arith.subf %35, %37 : vector<8x128xf32>
    %cst_5 = arith.constant 8.500000e-01 : f32
    %39 = vector.broadcast %cst_5 : f32 to vector<8x128xf32>
    %40 = arith.mulf %39, %34 : vector<8x128xf32>
    %41 = arith.subf %38, %40 : vector<8x128xf32>
    %c1_i32_6 = arith.constant 1 : i32
    %42 = arith.muli %arg0, %c1_i32_6 : i32
    %43 = arith.addi %42, %arg1 : i32
    %c1_i32_7 = arith.constant 1 : i32
    %44 = arith.addi %43, %c1_i32_7 : i32
    %c1024_i32 = arith.constant 1024 : i32
    %45 = arith.muli %44, %c1024_i32 : i32
    %c8_i32 = arith.constant 8 : i32
    %46 = arith.cmpi sgt, %45, %c8_i32 : i32
    %47 = arith.extui %46 : i1 to i32
    %c0_i32_8 = arith.constant 0 : i32
    %48 = arith.cmpi ne, %47, %c0_i32_8 : i32
    scf.if %48 {
      %55 = tpu.iota {dimensions = array<i32: 0>} : vector<8x128xi32>
      %56 = tpu.iota {dimensions = array<i32: 1>} : vector<8x128xi32>
      %c8_i32_12 = arith.constant 8 : i32
      %57 = arith.muli %43, %c8_i32_12 : i32
      %58 = vector.broadcast %57 : i32 to vector<8x128xi32>
      %59 = arith.addi %58, %55 : vector<8x128xi32>
      %c128_i32 = arith.constant 128 : i32
      %60 = vector.broadcast %c128_i32 : i32 to vector<8x128xi32>
      %61 = arith.muli %59, %60 : vector<8x128xi32>
      %62 = arith.addi %61, %56 : vector<8x128xi32>
      %c0_13 = arith.constant 0 : index
      %c0_14 = arith.constant 0 : index
      %63 = vector.load %arg5[%c0_13, %c0_14] : memref<8x128xf32, #tpu.memory_space<vmem>>, vector<8x128xf32>
      %c8_i32_15 = arith.constant 8 : i32
      %64 = vector.broadcast %c8_i32_15 : i32 to vector<8x128xi32>
      %65 = arith.cmpi slt, %62, %64 : vector<8x128xi32>
      %cst_16 = arith.constant 0.000000e+00 : f32
      %66 = vector.broadcast %cst_16 : f32 to vector<8x128xf32>
      %67 = arith.select %65, %41, %66 : vector<8x128xi1>, vector<8x128xf32>
      %68 = arith.addf %63, %67 : vector<8x128xf32>
      %c0_17 = arith.constant 0 : index
      %c0_18 = arith.constant 0 : index
      %69 = vector.load %arg5[%c0_17, %c0_18] : memref<8x128xf32, #tpu.memory_space<vmem>>, vector<8x128xf32>
      tpu.vector_store %arg5[%c0_17, %c0_18], %68 {strides = array<i32>} : memref<8x128xf32, #tpu.memory_space<vmem>>, vector<8x128xf32>,
    } else {
    }
    %true = arith.constant true
    %49 = arith.xori %46, %true : i1
    %50 = arith.extui %49 : i1 to i32
    %c0_i32_9 = arith.constant 0 : i32
    %51 = arith.cmpi ne, %50, %c0_i32_9 : i32
    scf.if %51 {
      %c0_12 = arith.constant 0 : index
      %c0_13 = arith.constant 0 : index
      %55 = vector.load %arg5[%c0_12, %c0_13] : memref<8x128xf32, #tpu.memory_space<vmem>>, vector<8x128xf32>
      %56 = arith.addf %55, %41 : vector<8x128xf32>
      %c0_14 = arith.constant 0 : index
      %c0_15 = arith.constant 0 : index
      %57 = vector.load %arg5[%c0_14, %c0_15] : memref<8x128xf32, #tpu.memory_space<vmem>>, vector<8x128xf32>
      tpu.vector_store %arg5[%c0_14, %c0_15], %56 {strides = array<i32>} : memref<8x128xf32, #tpu.memory_space<vmem>>, vector<8x128xf32>,
    } else {
    }
    %c0_i32_10 = arith.constant 0 : i32
    %52 = arith.cmpi eq, %arg1, %c0_i32_10 : i32
    %53 = arith.extui %52 : i1 to i32
    %c0_i32_11 = arith.constant 0 : i32
    %54 = arith.cmpi ne, %53, %c0_i32_11 : i32
    scf.if %54 {
      %c0_12 = arith.constant 0 : index
      %c0_13 = arith.constant 0 : index
      %55 = vector.load %arg5[%c0_12, %c0_13] : memref<8x128xf32, #tpu.memory_space<vmem>>, vector<8x128xf32>
      %c0_14 = arith.constant 0 : index
      %c0_15 = arith.constant 0 : index
      %c0_16 = arith.constant 0 : index
      %56 = vector.load %arg4[%c0_14, %c0_15, %c0_16] : memref<1x8x128xf32, #tpu.memory_space<vmem>>, vector<1x8x128xf32>
      %57 = vector.shape_cast %56 : vector<1x8x128xf32> to vector<8x128xf32>
      %58 = vector.shape_cast %55 : vector<8x128xf32> to vector<1x8x128xf32>
      tpu.vector_store %arg4[%c0_14, %c0_15, %c0_16], %58 {strides = array<i32>} : memref<1x8x128xf32, #tpu.memory_space<vmem>>, vector<1x8x128xf32>,
    } else {
    }
    return
  }
  func.func @transform_0(%arg0: i32, %arg1: i32) -> (i32, i32, i32) {
    %c1_i32 = arith.constant 1 : i32
    %0 = arith.muli %arg0, %c1_i32 : i32
    %1 = arith.addi %0, %arg1 : i32
    %c0_i32 = arith.constant 0 : i32
    %2 = arith.minsi %1, %c0_i32 : i32
    %c0_i32_0 = arith.constant 0 : i32
    %c0_i32_1 = arith.constant 0 : i32
    %c0_i32_2 = arith.constant 0 : i32
    return %c0_i32_0, %2, %c0_i32_1 : i32, i32, i32
  }
  func.func @transform_1(%arg0: i32, %arg1: i32) -> (i32, i32) {
    %c1_i32 = arith.constant 1 : i32
    %0 = arith.muli %arg0, %c1_i32 : i32
    %1 = arith.addi %0, %arg1 : i32
    %c0_i32 = arith.constant 0 : i32
    %2 = arith.minsi %1, %c0_i32 : i32
    %c0_i32_0 = arith.constant 0 : i32
    %c0_i32_1 = arith.constant 0 : i32
    return %2, %c0_i32_0 : i32, i32
  }
  func.func @transform_2(%arg0: i32, %arg1: i32) -> (i32, i32, i32) {
    %c0_i32 = arith.constant 0 : i32
    %c0_i32_0 = arith.constant 0 : i32
    %c0_i32_1 = arith.constant 0 : i32
    return %arg0, %c0_i32, %c0_i32_0 : i32, i32, i32
  }
}

</mosaic_0001>

<bundles_post_ra>
// kernel: tpu_custom_call.1
= control target key start
LH: loop header
LB: loop body
LE: loop exit
PB: predicated region body
PF: predicated region fallthrough
CT: control target
= control target key end

     0   :  { %7 = vsyncpa [#allocation4], 0  ;;  %s934_s0 = inlined_call_operand.hbm [shape: f32[3,8,128], index: 0, kind: input, shape index: {}]   ;;  %s935_s1 = inlined_call_operand.hbm [shape: s32[8,128], index: 1, kind: input, shape index: {}]   ;;  %s936_s2 = inlined_call_operand.hbm [shape: f32[2,8,128], index: 2, kind: output, shape index: {}]  }
   0x1   :  { %9 = vsyncpa [#allocation4 + $0x1], 0 }
   0x2   :  { %10 = vsyncpa [#allocation7], 0 }
   0x3   :  { %12 = vsyncpa [#allocation7 + $0x1], 0 }
   0x4   :  { %13 = vsyncpa [#allocation5], 0 }
   0x5   :  { %15 = vsyncpa [#allocation5 + $0x1], 0  ;;  %s730_s9 = smov 0   ;;  %s732_s10 = smov 0  }
   0x6   :  { %s734_s11 = smov 0   ;;  %s736_s12 = smov 0  }
   0x7   :  { %s738_s13 = smov 0   ;;  %s740_s14 = smov 0  }
   0x8   :  { %s742_s15 = smov 0   ;;  %s744_s16 = smov 0  }
   0x9 LB: > { %s416_s17 = sadd.s32 4294967295, %s707_s16   ;;  %s417_s18 = sadd.s32 4294967294, %s707_s16   ;;  %s707_s16 = sphi %s744_s16, %s21_s16   ;;  %s703_s15 = sphi %s742_s15, %s955_s15   ;;  %s699_s14 = sphi %s740_s14, %s954_s14   ;;  %s695_s13 = sphi %s738_s13, %s924_s13   ;;  %s691_s12 = sphi %s736_s12, %s953_s12   ;;  %s687_s11 = sphi %s734_s11, %s952_s11   ;;  %s683_s10 = sphi %s732_s10, %s951_s10   ;;  %s679_s9 = sphi %s730_s9, %s950_s9  }
   0xa   : > { %s33_s19 = sadd.s32 1, %s703_s15  ;;  %p676_p1 = scmp.ne.s32.totalorder %s695_s13, 0 }
   0xb   : > { %p35_p0 = scmp.ge.s32.totalorder %s33_s19, 2  ;;  %p54_p2 = scmp.eq.s32.totalorder %s707_s16, 0 }
   0xc   : > { %p59_p3 = scmp.ne.s32.totalorder %s695_s13, %s691_s12  ;;  %p60_p5 = scmp.eq.s32.totalorder %s416_s17, 0 }
   0xd   : > { %s957_s19 = smov (%p35_p0, %s33_s19), 0  ;;  %p776_p4 = por %p676_p1, %p54_p2 }
   0xe   : > { %p780_p6 = por %p60_p5, %p59_p3  ;;  %s101_s22 = ssub.s32 %s703_s15, %s957_s19 }
   0xf   : > { %p102_p7 = scmp.eq.s32.totalorder %s101_s22, 0  ;;  %s104_s23 = sadd.s32 1, %s687_s11 }
  0x10   : > { %s940_s21 = scalar_select %p780_p6, 1, 0 }
  0x11   : > { %s788_s24 = scalar_select %p102_p7, %s687_s11, %s104_s23  }
  0x12   : > { %p114_p8 = scmp.ne.s32.totalorder %s687_s11, %s683_s10  ;;  %p115_p9 = scmp.eq.s32.totalorder %s416_s17, 1 }
  0x13   : > { %p120_p10 = scmp.ne.s32.totalorder %s683_s10, %s679_s9  ;;  %p121_p11 = scmp.eq.s32.totalorder %s417_s18, 1 }
  0x14   : > { %p794_p12 = por %p115_p9, %p114_p8  ;;  %p455_p1 = scmp.lt.s32.totalorder %s707_s16, 2 }
  0x15   : > { %p799_p0 = por %p121_p11, %p120_p10  ;;  %s709_s28 = smov [#allocation3]  }
  0x16   : > { %s941_s25 = scalar_select %p794_p12, 1, 0 }
  0x17   : > { %s942_s26 = scalar_select %p799_p0, 1, 0 }
  0x18   : > { %p806_p2 = pnand %p455_p1, %p776_p4  ;;  %s154_s29 = sshll.u32 %s709_s28, 4  ;;  %s155_s29 = int_to_ptr.vmem [resolvable:$true] %s154_s29 }
  0x19   : > { %s540_s4 = scalar_lea.hbm %s934_s0, 384 }
  0x1a   : > { %p541_p3 = scmp.ne.s32.totalorder %s934_s0, %s540_s4  ;;  %p542_p5 = pneg %p806_p2 }
  0x1b   : > { %p547_p8 = scmp.lt.u32.totalorder %s540_s4, %s540_s4  ;;  %p549_p9 = scmp.lt.u32.totalorder %s540_s4, %s934_s0 }
  0x1c   : > { %p543_p4 = pnand %p542_p5, %p541_p3 }
  0x1d   : > { %p550_p10 = por %p549_p9, %p547_p8 }
  0x1e   : > { %p544_p7 = pneg %p543_p4 }
  0x20   : > { %p551_p11 = pnand %p550_p10, %p544_p7 }
  0x22   : > { %554 = shalt.err (!%p551_p11)
}
  0x23   : > { %s555_s12 = scalar_lea.vmem %s155_s29, 384  ;;  %s562_s17 = scalar_lea.vmem %s155_s29, 768 }
  0x24   : > { %p556_p1 = scmp.ne.s32.totalorder %s155_s29, %s555_s12  ;;  %p563_p12 = scmp.lt.s32.totalorder %s155_s29, %s155_s29 }
  0x25   : > { %p564_p6 = scmp.lt.s32.totalorder %s562_s17, %s555_s12 }
  0x26   : > { %p558_p13 = pnand %p556_p1, %p542_p5 }
  0x27   : > { %p565_p3 = por %p564_p6, %p563_p12 }
  0x28   : > { %p559_p0 = pneg %p558_p13 }
  0x2a   : > { %p566_p4 = pnand %p565_p3, %p559_p0 }
  0x2c   : > { %569 = shalt.err (!%p566_p4)
}
  0x2d   : > { %s710_s18 = smov 128   ;;  %s711_s20 = smov 8  }
  0x2e   : > { %447 = dma.hbm_to_vmem [thread:$0]  (!%p806_p2), %s934_s0, 384, %s155_s29, [#allocation4], %s710_s18, %s710_s18, %s711_s20  }
  0x2f   : > { %p423_p7 = scmp.ge.s32.totalorder %s707_s16, 1  ;;  %p183_p8 = scmp.lt.s32.totalorder %s707_s16, 3 }
  0x30   : > { %s712_s30 = smov [#allocation6]   ;;  %s570_s6 = scalar_lea.hbm %s935_s1, 128 }
  0x31   : > { %p834_p13 = pnand %p423_p7, %p183_p8  ;;  %s178_s3 = sshll.u32 %s712_s30, 4  ;;  %s179_s3 = int_to_ptr.vmem [resolvable:$true] %s178_s3 }
  0x32   : > { %p571_p6 = scmp.ne.s32.totalorder %s935_s1, %s570_s6  ;;  %p577_p9 = scmp.lt.u32.totalorder %s570_s6, %s570_s6 }
  0x33   : > { %s944_s28 = scalar_select %p834_p13, 1, 0 }
  0x34   : > { %p573_p12 = pnand %p571_p6, %p542_p5  ;;  %p579_p10 = scmp.lt.u32.totalorder %s570_s6, %s935_s1 }
  0x36   : > { %p574_p0 = pneg %p573_p12  ;;  %p580_p11 = por %p579_p10, %p577_p9 }
  0x38   : > { %p581_p1 = pnand %p580_p11, %p574_p0 }
  0x3a   : > { %584 = shalt.err (!%p581_p1)
}
  0x3b   : > { %s585_s17 = scalar_lea.vmem %s179_s3, 128  ;;  %s592_s18 = scalar_lea.vmem %s179_s3, 256 }
  0x3c   : > { %p586_p3 = scmp.ne.s32.totalorder %s179_s3, %s585_s17  ;;  %p593_p8 = scmp.lt.s32.totalorder %s179_s3, %s179_s3 }
  0x3d   : > { %p594_p13 = scmp.lt.s32.totalorder %s592_s18, %s585_s17 }
  0x3e   : > { %p588_p4 = pnand %p586_p3, %p542_p5 }
  0x3f   : > { %p595_p6 = por %p594_p13, %p593_p8 }
  0x40   : > { %p589_p7 = pneg %p588_p4 }
  0x42   : > { %p596_p12 = pnand %p595_p6, %p589_p7 }
  0x44   : > { %599 = shalt.err (!%p596_p12)
}
  0x45   : > { %450 = dma.hbm_to_vmem [thread:$0]  (!%p806_p2), %s935_s1, 128, %s179_s3, [#allocation7]  }
  0x46   : > { %p945_p0 = scmp.ne.s32.totalorder %s944_s28, 0 }
  0x47   : > { %s189_s23 = sand.u32 (!%p945_p0), 1, %s695_s13   ;;  %p946_p5 = scmp.ne.s32.totalorder (!%p945_p0), %s940_s21, 0 }
  0x48   : > { %187 = sbr.rel (%p945_p0) target bundleno = 164 (0xa4), region = 28  ;;  %s190_s4 = scalar_lea.sflag (!%p945_p0), [#allocation4], %s189_s23 }
  0x49   : > { %s437_s30 = smul.u32 (!%p945_p0), 24, %s189_s23 }
  0x4b   : > { %s193_s5 = scalar_lea.vmem (!%p945_p0), [#allocation3], %s437_s30 }
  0x4f   : > { %665 = dma.done.wait (%p946_p5), %s190_s4, 384  }
  0x50   : > { %667 = vsyncadd (%p946_p5), %s190_s4, 4294966912  ;;  %s424_s27 = sshll.u32 %s189_s23, 3  ;;  %s199_s6 = scalar_lea.sflag [#allocation7], %s189_s23 }
  0x51   : > { %s202_s7 = scalar_lea.vmem [#allocation6], %s424_s27 }
  0x52   : > { %669 = dma.done.wait (%p946_p5), %s199_s6, 128  }
  0x53   : > { %671 = vsyncadd (%p946_p5), %s199_s6, 4294967168  ;;  %s225_s28 = sand.u32 1, %s683_s10   ;;  %s434_s3 = sshll.u32 %s699_s14, 10  ;;  %v713_v0 = vmov 0.0   ;;  %v239_v1 = vld [vmem:[%s193_s5] sm:$0xff]  ;;  %v240_v2 = vld [vmem:[%s193_s5 + $0x8] sm:$0xff] }
  0x54   : > { %s873_s8 = sshll.u32 %s225_s28, 3  ;;  %238 = vst [vmem:[#allocation2] sm:$0xff] %v713_v0  ;;  %s875_s29 = sadd.s32 1024, %s434_s3  ;;  %v241_v3 = vld [vmem:[%s193_s5 + $0x10] sm:$0xff]  ;;  %v243_v4 = vmax.f32 %v239_v1, %v240_v2 }
  0x55   : > { %v242_v17 = vld [vmem:[%s202_s7] sm:$0xff]  ;;  %s227_s21 = scalar_lea.vmem [#allocation8], %s873_s8  ;;  %p427_p2 = scmp.le.s32.totalorder %s875_s29, 8 }
  0x56   : > { %v244_v5 = vmax.f32 %v243_v4, %v241_v3  ;;  %vm253_vm0 = vcmp.eq.s32.totalorder %v242_v17, 1  ;;  %vm260_vm1 = vcmp.eq.s32.totalorder %v242_v17, 2  ;;  %v275_v28 = vlaneseq (!%p427_p2)  ;;  %s428_s12 = sshll.u32 (!%p427_p2), %s699_s14, 3 }
  0x57   : > { %v280_v29 = vstv (!%p427_p2), %s428_s12 }
  0x58   : > { %v245_v6 = vsub.f32 %v239_v1, %v244_v5  ;;  %v248_v7 = vsub.f32 %v240_v2, %v244_v5  ;;  %v255_v8 = vsub.f32 %v241_v3, %v244_v5  ;;  %v276_v30 = vshrl.u32 (!%p427_p2), %v275_v28, 7 }
  0x59   : > { %v278_v31 = vand.u32 (!%p427_p2), 127, %v275_v28 }
  0x5a   : > { %v246_v9 = vmul.f32 1.442695, %v245_v6  ;;  %v250_v10 = vmul.f32 1.442695, %v248_v7  ;;  %v257_v11 = vmul.f32 1.442695, %v255_v8  ;;  %v249_v18 = vadd.f32 %v248_v7, %v245_v6 }
  0x5b   : > { %v254_v19 = vsel %vm253_vm0, %v248_v7, %v245_v6  ;;  %v281_v32 = vadd.s32 (!%p427_p2), %v280_v29, %v276_v30  ;;  %v284_v35 = vld [vmem:[#allocation2] sm:$0xff] (!%p427_p2) }
  0x5c   : > { %532 = vpow2.f32 %v246_v9  ;;  %v256_v20 = vadd.f32 %v255_v8, %v249_v18  ;;  %v261_v21 = vsel %vm260_vm1, %v255_v8, %v254_v19 }
  0x5d   : > { %534 = vpow2.f32 %v250_v10  ;;  %v266_v25 = vmul.f32 0.85, %v261_v21  ;;  %v282_v33 = vmul.u32 (!%p427_p2), 128, %v281_v32 }
  0x5e   : > { %536 = vpow2.f32 %v257_v11  ;;  %v264_v22 = vmul.f32 0.05, %v256_v20 }
  0x5f   : > { %v283_v34 = vadd.s32 (!%p427_p2), %v282_v33, %v278_v31 }
  0x61   : > { %vm285_vm2 = vcmp.lt.s32.totalorder (!%p427_p2), %v283_v34, 8 }
  0x66   : > { %v533_v12 = vpop.eup %532 }
  0x67   : > { %v535_v13 = vpop.eup %534 }
  0x68   : > { %v537_v14 = vpop.eup %536  ;;  %v252_v15 = vadd.f32 %v535_v13, %v533_v12 }
  0x6a   : > { %v259_v16 = vadd.f32 %v537_v14, %v252_v15 }
  0x6c   : > { %538 = vlog2.f32 %v259_v16 }
  0x75   : > { %274 = sbr.rel (%p427_p2) target bundleno = 129 (0x81), region = 44 }
  0x76   : > { %v539_v23 = vpop.eup %538 }
  0x77   : > { %v263_v24 = vmul.f32 0.6931472, %v539_v23 }
  0x79   : > { %v265_v26 = vsub.f32 %v263_v24, %v264_v22 }
  0x7b   : > { %v267_v27 = vsub.f32 %v265_v26, %v266_v25 }
  0x7d   : > { %v286_v36 = vsel %vm285_vm2, %v267_v27, 0.0 }
  0x7e   : > { %v287_v37 = vadd.f32 %v286_v36, %v284_v35 }
  0x80   : > { %288 = vst [vmem:[#allocation2] sm:$0xff] %v287_v37 }
  0x81 PF: > { %p429_p13 = scmp.gt.s32.totalorder %s875_s29, 8 }
  0x83   : > { %292 = sbr.rel (%p429_p13) target bundleno = 139 (0x8b), region = 48 }
  0x87   : > { %v293_v38 = vld [vmem:[#allocation2] sm:$0xff] (!%p429_p13) }
  0x88   : > { %v294_v39 = vadd.f32 (!%p429_p13), %v293_v38, %v267_v27 }
  0x8a   : > { %295 = vst [vmem:[#allocation2] sm:$0xff] %v294_v39 }
  0x8b PF: > { %s431_s17 = sshll.u32 %s699_s14, 7  ;;  %s315_s23 = sshll.u32 %s227_s21, 4  ;;  %s316_s23 = int_to_ptr.vmem [resolvable:$true] %s315_s23 }
  0x8c   : > { %s885_s22 = scalar_lea.hbm %s936_s2, %s431_s17  ;;  %s302_s30 = scalar_lea.sflag [#allocation5], %s225_s28 }
  0x8d   : > { %s600_s4 = scalar_lea.vmem %s316_s23, 128  ;;  %p947_p10 = scmp.ne.s32.totalorder %s941_s25, 0 }
  0x8e   : > { %p601_p9 = scmp.ne.s32.totalorder %s316_s23, %s600_s4  ;;  %s714_s5 = smov [#allocation8]  }
  0x8f   : > { %s604_s27 = sshll.u32 %s714_s5, 4  ;;  %s605_s27 = int_to_ptr.vmem [resolvable:$false] %s604_s27 }
  0x90   : > { %p602_p11 = pnand %p601_p9, %p947_p10  ;;  %s606_s6 = scalar_lea.vmem %s605_s27, 256 }
  0x91   : > { %v299_v40 = vld [vmem:[#allocation2] sm:$0xff]  ;;  %p607_p3 = scmp.lt.s32.totalorder %s316_s23, %s605_s27  ;;  %p608_p4 = scmp.lt.s32.totalorder %s606_s6, %s600_s4 }
  0x92   : > { %300 = vst [vmem:[%s227_s21] sm:$0xff] %v299_v40  ;;  %p603_p1 = pneg %p602_p11 }
  0x93   : > { %p609_p7 = por %p608_p4, %p607_p3 }
  0x95   : > { %p610_p8 = pnand %p609_p7, %p603_p1 }
  0x97   : > { %613 = shalt.err (!%p610_p8)
}
  0x98   : > { %s614_s14 = scalar_lea.hbm %s885_s22, 128  ;;  %s618_s3 = scalar_lea.hbm %s936_s2, 256 }
  0x99   : > { %p615_p6 = scmp.ne.s32.totalorder %s885_s22, %s614_s14  ;;  %p619_p5 = scmp.lt.u32.totalorder %s885_s22, %s936_s2 }
  0x9a   : > { %p620_p2 = scmp.lt.u32.totalorder %s618_s3, %s614_s14  ;;  %p622_p9 = scmp.lt.u32.totalorder %s614_s14, %s885_s22 }
  0x9b   : > { %p616_p12 = pnand %p615_p6, %p947_p10 }
  0x9c   : > { %p621_p13 = por %p620_p2, %p619_p5 }
  0x9d   : > { %p617_p0 = pneg %p616_p12 }
  0x9e   : > { %p623_p11 = por %p622_p9, %p621_p13 }
  0xa0   : > { %p624_p1 = pnand %p623_p11, %p617_p0 }
  0xa2   : > { %627 = shalt.err (!%p624_p1)
}
  0xa3   : > { %442 = dma.vmem_to_hbm [thread:$0]  (%p947_p10), %s316_s23, 128, %s885_s22, %s302_s30  }
  0xa4 PF: > { %s327_s21 = sand.u32 1, %s679_s9   ;;  %p948_p3 = scmp.ne.s32.totalorder %s942_s26, 0 }
  0xa5   : > { %p949_p4 = scmp.ge.s32.totalorder %s707_s16, 2  ;;  %s328_s12 = scalar_lea.sflag [#allocation5], %s327_s21 }
  0xa7   : > { %p452_p7 = pnand %p949_p4, %p948_p3 }
  0xa9   : > { %673 = dma.done.wait (!%p452_p7), %s328_s12, 128  }
  0xaa   : > { %675 = vsyncadd (!%p452_p7), %s328_s12, 4294967168  ;;  %s21_s16 = sadd.s32 1, %s707_s16   ;;  %s950_s9 = smov %s683_s10 }
  0xab   : > { %p18_p8 = scmp.ge.s32.totalorder %s21_s16, 4   ;;  %s951_s10 = smov %s687_s11 }
  0xac   : > { %s952_s11 = smov %s788_s24  ;;  %s953_s12 = smov %s695_s13 }
  0xad   : > { %s924_s13 = smov 0   ;;  %s954_s14 = smov %s703_s15 }
  0xae   : > { %s955_s15 = smov %s957_s19  ;;  %20 = sbr.rel (!%p18_p8) target bundleno = 9 (0x9), region = 102 }
  0xb5   :  { %333 = vsyncpa [#allocation4], 1 }
  0xb6   :  { %335 = vsyncpa [#allocation4 + $0x1], 1 }
  0xb7   :  { %336 = vsyncpa [#allocation7], 1 }
  0xb8   :  { %338 = vsyncpa [#allocation7 + $0x1], 1 }
  0xb9   :  { %339 = vsyncpa [#allocation5], 1 }
  0xba   :  { %341 = vsyncpa [#allocation5 + $0x1], 1 }

</bundles_post_ra>
